<compile_context>
chip_gen: v6e
topology: v6e:2x2x1
jax: 0.10.0
libtpu: 0.0.40
codegen_flags: <defaults>
</compile_context>

<pallas_src>
import functools

import jax
import jax.numpy as jnp
from jax import lax
from jax.experimental import pallas as pl
from jax.experimental.pallas import tpu as pltpu

_LANES = 128
_SUBLANES = 8


# ---------------------------------------------------------------------------
# Pallas kernel: Wiener-style pseudo-inverse solve in the frequency domain.
#   rhs = sum_c conj(H_c) * Y_c        (complex)
#   lhs = sum_c |H_c|^2                (real)
#   X   = rhs / lhs                    (complex)
# Refs:
#   hr/hi/yr/yi : (C, t_rows, 128) float32   (one pixel tile, all channels)
#   xr/xi       : (t_rows, 128)    float32
# ---------------------------------------------------------------------------
def _deconv_kernel(hr_ref, hi_ref, yr_ref, yi_ref, xr_ref, xi_ref, *, chunk):
    num_channels = hr_ref.shape[0]
    t_rows = xr_ref.shape[0]
    n_chunks = t_rows // chunk

    def chunk_body(k, carry):
        r0 = pl.multiple_of(k * chunk, chunk)

        def chan_body(c, acc):
            rhs_r, rhs_i, lhs = acc
            hr = hr_ref[c, pl.ds(r0, chunk), :]
            hi = hi_ref[c, pl.ds(r0, chunk), :]
            yr = yr_ref[c, pl.ds(r0, chunk), :]
            yi = yi_ref[c, pl.ds(r0, chunk), :]
            # conj(H) * Y = (Hr - i Hi)(Yr + i Yi)
            rhs_r = rhs_r + (hr * yr + hi * yi)
            rhs_i = rhs_i + (hr * yi - hi * yr)
            lhs = lhs + (hr * hr + hi * hi)
            return rhs_r, rhs_i, lhs

        zeros = jnp.zeros((chunk, _LANES), jnp.float32)
        rhs_r, rhs_i, lhs = lax.fori_loop(
            0, num_channels, chan_body, (zeros, zeros, zeros))

        # NOTE: like the PyTorch reference, there is NO regularization term; at
        # frequencies where sum_c |H_c|^2 == 0 this produces inf/NaN (also in
        # the zero-padded tail rows, which are cropped before any further use).
        # approx=False -> exact reciprocal (EUP seed + VPU Newton refinement),
        # matching torch's rhs/lhs to ~1 ulp; the extra VPU work is fully
        # hidden under the HBM DMA on all generations.
        inv = pl.reciprocal(lhs, approx=False)
        xr_ref[pl.ds(r0, chunk), :] = rhs_r * inv
        xi_ref[pl.ds(r0, chunk), :] = rhs_i * inv
        return carry

    lax.fori_loop(0, n_chunks, chunk_body, 0)


def _pseudo_inverse_solve(Hr, Hi, Yr, Yi, *, tile_rows=1024):
    """Hr/Hi/Yr/Yi: (B, C, P, Q) float32 -> (Xr, Xi): (B, 1, P, Q) float32."""
    B, C, P, Q = Hr.shape
    npix = P * Q

    # Lane-dense layout: flatten pixels, view as (rows, 128).
    rows = pl.cdiv(npix, _LANES)
    rows8 = pl.cdiv(rows, _SUBLANES) * _SUBLANES

    # Tile sizing: as large as possible while the double-buffered working set
    # (4C input planes + 2 output planes per step) stays <= ~24 MiB -> fits the
    # 32 MiB scoped-VMEM limit with headroom on v5e/v6e (128 MiB) and v7x (64).
    budget = 24 * 1024 * 1024
    bytes_per_row = 2 * (4 * C + 2) * _LANES * 4          # double-buffered
    rows_budget = max(_SUBLANES,
                      (budget // bytes_per_row) // _SUBLANES * _SUBLANES)
    t_rows = min(int(tile_rows), rows8, rows_budget)
    t_rows = max(_SUBLANES, (t_rows // _SUBLANES) * _SUBLANES)

    # v7x megacore: both grid axes are "parallel"; when B == 1 make sure the
    # pixel-tile axis alone still exposes >= 2 program instances.
    if B < 2 and rows8 >= 2 * _SUBLANES:
        half = pl.cdiv(rows8 // 2, _SUBLANES) * _SUBLANES
        t_rows = min(t_rows, half)

    rows_pad = pl.cdiv(rows8, t_rows) * t_rows             # multiple of t_rows
    npix_pad = rows_pad * _LANES

    # Inner compute-chunk (rows): bounds accumulator/operand vreg pressure
    # (~36 live vregs at chunk=32) while the BlockSpec DMA tile stays large.
    chunk = 32
    while t_rows % chunk:
        chunk //= 2          # t_rows is a multiple of 8 -> lands on 16 or 8.

    def prep(a):
        a = a.reshape(B, C, npix)
        if npix_pad != npix:
            # Zero-padding makes lhs==0 -> NaN in the pad region only; it is
            # cropped away below before any further use.
            a = jnp.pad(a, ((0, 0), (0, 0), (0, npix_pad - npix)))
        return a.reshape(B, C, rows_pad, _LANES)

    hr, hi, yr, yi = prep(Hr), prep(Hi), prep(Yr), prep(Yi)

    grid = (B, rows_pad // t_rows)
    in_spec = pl.BlockSpec((None, C, t_rows, _LANES), lambda b, t: (b, 0, t, 0))
    out_spec = pl.BlockSpec((None, None, t_rows, _LANES), lambda b, t: (b, 0, t, 0))

    Xr, Xi = pl.pallas_call(
        functools.partial(_deconv_kernel, chunk=chunk),
        out_shape=(
            jax.ShapeDtypeStruct((B, 1, rows_pad, _LANES), jnp.float32),
            jax.ShapeDtypeStruct((B, 1, rows_pad, _LANES), jnp.float32),
        ),
        grid_spec=pltpu.PrefetchScalarGridSpec(
            num_scalar_prefetch=0,
            grid=grid,
            in_specs=[in_spec, in_spec, in_spec, in_spec],
            out_specs=[out_spec, out_spec],
        ),
        compiler_params=pltpu.CompilerParams(
            # Both axes independent -> megacore-shardable on v7x.
            dimension_semantics=("parallel", "parallel"),
            # Working set is capped at ~24 MiB double-buffered; 32 MiB is safe
            # on v5e/v6e (128 MiB physical) and v7x (64 MiB physical) alike.
            vmem_limit_bytes=32 * 1024 * 1024,
        ),
    )(hr, hi, yr, yi)

    def unprep(a):
        a = a.reshape(B, 1, npix_pad)[:, :, :npix]
        return a.reshape(B, 1, P, Q)

    return unprep(Xr), unprep(Xi)


# ---------------------------------------------------------------------------
# Glue (plain JAX): pad / crop / FFT plumbing, matching the PyTorch reference.
# ---------------------------------------------------------------------------
def pad_double(y):
    """Centered zero-pad last two spatial dims from (N, M) to (2N, 2M)."""
    *lead, n, m = y.shape
    pad = [(0, 0)] * len(lead) + [(n // 2, n - n // 2), (m // 2, m - m // 2)]
    return jnp.pad(y, pad)


def crop_half(x):
    """Crop the centered (N, M) region out of a (2N, 2M) spatial extent."""
    *_, p, q = x.shape
    n, m = p // 2, q // 2
    return x[..., n // 2:n // 2 + n, m // 2:m // 2 + m]


def multi_channel_deconv(y, H):
    """
    y: (B, C, N, M) float32 real image stack.
    H: (B, C, 2N, 2M) complex64 per-channel frequency responses.
    Returns (x_cropped, X, Y) exactly as the PyTorch module does.
    """
    # TODO(synk): FFT/IFFT/fftshift have no Pallas TPU equivalent; kept in jnp.fft.
    Y = jnp.fft.fft2(jnp.fft.ifftshift(pad_double(y), axes=(-2, -1)))
    Y = Y.astype(jnp.complex64)
    H = H.astype(jnp.complex64)

    # TODO(synk): complex64<->f32 bitcast is rejected by lax.bitcast_convert_type,
    # so the split (and the recombine below) are unavoidable XLA copies; they are
    # kept adjacent to the pallas_call so XLA fuses them with the reshape/pad.
    Hr = jnp.real(H).astype(jnp.float32)
    Hi = jnp.imag(H).astype(jnp.float32)
    Yr = jnp.real(Y).astype(jnp.float32)
    Yi = jnp.imag(Y).astype(jnp.float32)

    # Hot path in Pallas: channel-summed conj(H)*Y and |H|^2, then divide.
    Xr, Xi = _pseudo_inverse_solve(Hr, Hi, Yr, Yi)
    X = jax.lax.complex(Xr, Xi)                        # (B, 1, 2N, 2M) complex64

    # x = fftshift(ifft2(X)).real ; crop back to original spatial size.
    x = jnp.real(jnp.fft.fftshift(jnp.fft.ifft2(X), axes=(-2, -1)))
    x = x.astype(jnp.float32)
    return crop_half(x), X, Y


if __name__ == "__main__":
    key = jax.random.PRNGKey(0)
    k_y, k_hr, k_hi = jax.random.split(key, 3)

    B, C, N, M = 2, 4, 16, 16
    y = jax.random.normal(k_y, (B, C, N, M), dtype=jnp.float32)
    H = (jax.random.normal(k_hr, (B, C, 2 * N, 2 * M), dtype=jnp.float32)
         + 1j * jax.random.normal(k_hi, (B, C, 2 * N, 2 * M), dtype=jnp.float32)
         ).astype(jnp.complex64)

    x_out, X_out, Y_out = jax.jit(multi_channel_deconv)(y, H)
    jax.block_until_ready((x_out, X_out, Y_out))

    assert x_out.shape == (B, 1, N, M)
    assert X_out.shape == (B, 1, 2 * N, 2 * M)
    assert Y_out.shape == (B, C, 2 * N, 2 * M)
    print("KERNEL_OK")
</pallas_src>

<mosaic_0001>
module attributes {stable_mosaic.version = 11 : i64} {
  func.func @_deconv_kernel(%arg0: i32, %arg1: i32, %arg2: memref<1x4x8x128xf32, #tpu.memory_space<vmem>>, %arg3: memref<1x4x8x128xf32, #tpu.memory_space<vmem>>, %arg4: memref<1x4x8x128xf32, #tpu.memory_space<vmem>>, %arg5: memref<1x4x8x128xf32, #tpu.memory_space<vmem>>, %arg6: memref<1x1x8x128xf32, #tpu.memory_space<vmem>>, %arg7: memref<1x1x8x128xf32, #tpu.memory_space<vmem>>) attributes {dimension_semantics = [#tpu.dimension_semantics<parallel>, #tpu.dimension_semantics<parallel>], iteration_bounds = array<i64: 2, 1>, scalar_prefetch = 0 : i64, scratch_operands = 0 : i64, tpu.core_type = #tpu.core_type<tc>, window_params = [{transform_indices = @transform_0, window_bounds = array<i64: 1, 4, 8, 128>}, {transform_indices = @transform_1, window_bounds = array<i64: 1, 4, 8, 128>}, {transform_indices = @transform_2, window_bounds = array<i64: 1, 4, 8, 128>}, {transform_indices = @transform_3, window_bounds = array<i64: 1, 4, 8, 128>}, {transform_indices = @transform_4, window_bounds = array<i64: 1, 1, 8, 128>}, {transform_indices = @transform_5, window_bounds = array<i64: 1, 1, 8, 128>}]} {
    %c0_i32 = arith.constant 0 : i32
    %c8_i32 = arith.constant 8 : i32
    %0 = arith.muli %c0_i32, %c8_i32 : i32
    %1 = tpu.assume_multiple %0, 8 : i32
    %cst = arith.constant 0.000000e+00 : f32
    %2 = vector.broadcast %cst : f32 to vector<8x128xf32>
    %c0_i32_0 = arith.constant 0 : i32
    %c4_i32 = arith.constant 4 : i32
    %3 = arith.addi %c0_i32_0, %c4_i32 : i32
    %c1_i32 = arith.constant 1 : i32
    %4:3 = scf.for %arg8 = %c0_i32_0 to %3 step %c1_i32 iter_args(%arg9 = %2, %arg10 = %2, %arg11 = %2) -> (vector<8x128xf32>, vector<8x128xf32>, vector<8x128xf32>)  : i32 {
      %c0_8 = arith.constant 0 : index
      %16 = arith.index_cast %arg8 : i32 to index
      %17 = arith.index_cast %1 : i32 to index
      %c0_9 = arith.constant 0 : index
      %18 = vector.load %arg2[%c0_8, %16, %17, %c0_9] : memref<1x4x8x128xf32, #tpu.memory_space<vmem>>, vector<1x1x8x128xf32>
      %19 = vector.shape_cast %18 : vector<1x1x8x128xf32> to vector<8x128xf32>
      %c0_10 = arith.constant 0 : index
      %20 = arith.index_cast %arg8 : i32 to index
      %21 = arith.index_cast %1 : i32 to index
      %c0_11 = arith.constant 0 : index
      %22 = vector.load %arg3[%c0_10, %20, %21, %c0_11] : memref<1x4x8x128xf32, #tpu.memory_space<vmem>>, vector<1x1x8x128xf32>
      %23 = vector.shape_cast %22 : vector<1x1x8x128xf32> to vector<8x128xf32>
      %c0_12 = arith.constant 0 : index
      %24 = arith.index_cast %arg8 : i32 to index
      %25 = arith.index_cast %1 : i32 to index
      %c0_13 = arith.constant 0 : index
      %26 = vector.load %arg4[%c0_12, %24, %25, %c0_13] : memref<1x4x8x128xf32, #tpu.memory_space<vmem>>, vector<1x1x8x128xf32>
      %27 = vector.shape_cast %26 : vector<1x1x8x128xf32> to vector<8x128xf32>
      %c0_14 = arith.constant 0 : index
      %28 = arith.index_cast %arg8 : i32 to index
      %29 = arith.index_cast %1 : i32 to index
      %c0_15 = arith.constant 0 : index
      %30 = vector.load %arg5[%c0_14, %28, %29, %c0_15] : memref<1x4x8x128xf32, #tpu.memory_space<vmem>>, vector<1x1x8x128xf32>
      %31 = vector.shape_cast %30 : vector<1x1x8x128xf32> to vector<8x128xf32>
      %32 = arith.mulf %19, %27 : vector<8x128xf32>
      %33 = arith.mulf %23, %31 : vector<8x128xf32>
      %34 = arith.addf %32, %33 : vector<8x128xf32>
      %35 = arith.addf %arg9, %34 : vector<8x128xf32>
      %36 = arith.mulf %19, %31 : vector<8x128xf32>
      %37 = arith.mulf %23, %27 : vector<8x128xf32>
      %38 = arith.subf %36, %37 : vector<8x128xf32>
      %39 = arith.addf %arg10, %38 : vector<8x128xf32>
      %40 = arith.mulf %19, %19 : vector<8x128xf32>
      %41 = arith.mulf %23, %23 : vector<8x128xf32>
      %42 = arith.addf %40, %41 : vector<8x128xf32>
      %43 = arith.addf %arg11, %42 : vector<8x128xf32>
      scf.yield %35, %39, %43 : vector<8x128xf32>, vector<8x128xf32>, vector<8x128xf32>
    }
    %c4_i32_1 = arith.constant 4 : i32
    %5 = tpu.reciprocal %4#2 : vector<8x128xf32> -> vector<8x128xf32>
    %6 = arith.mulf %4#0, %5 : vector<8x128xf32>
    %c0 = arith.constant 0 : index
    %c0_2 = arith.constant 0 : index
    %7 = arith.index_cast %1 : i32 to index
    %c0_3 = arith.constant 0 : index
    %8 = vector.load %arg6[%c0, %c0_2, %7, %c0_3] : memref<1x1x8x128xf32, #tpu.memory_space<vmem>>, vector<1x1x8x128xf32>
    %9 = vector.shape_cast %8 : vector<1x1x8x128xf32> to vector<8x128xf32>
    %10 = vector.shape_cast %6 : vector<8x128xf32> to vector<1x1x8x128xf32>
    tpu.vector_store %arg6[%c0, %c0_2, %7, %c0_3], %10 {strides = array<i32>} : memref<1x1x8x128xf32, #tpu.memory_space<vmem>>, vector<1x1x8x128xf32>,
    %11 = arith.mulf %4#1, %5 : vector<8x128xf32>
    %c0_4 = arith.constant 0 : index
    %c0_5 = arith.constant 0 : index
    %12 = arith.index_cast %1 : i32 to index
    %c0_6 = arith.constant 0 : index
    %13 = vector.load %arg7[%c0_4, %c0_5, %12, %c0_6] : memref<1x1x8x128xf32, #tpu.memory_space<vmem>>, vector<1x1x8x128xf32>
    %14 = vector.shape_cast %13 : vector<1x1x8x128xf32> to vector<8x128xf32>
    %15 = vector.shape_cast %11 : vector<8x128xf32> to vector<1x1x8x128xf32>
    tpu.vector_store %arg7[%c0_4, %c0_5, %12, %c0_6], %15 {strides = array<i32>} : memref<1x1x8x128xf32, #tpu.memory_space<vmem>>, vector<1x1x8x128xf32>,
    %c1_i32_7 = arith.constant 1 : i32
    return
  }
  func.func @transform_0(%arg0: i32, %arg1: i32) -> (i32, i32, i32, i32) {
    %c0_i32 = arith.constant 0 : i32
    %c0_i32_0 = arith.constant 0 : i32
    %c0_i32_1 = arith.constant 0 : i32
    return %arg0, %c0_i32, %arg1, %c0_i32_0 : i32, i32, i32, i32
  }
  func.func @transform_1(%arg0: i32, %arg1: i32) -> (i32, i32, i32, i32) {
    %c0_i32 = arith.constant 0 : i32
    %c0_i32_0 = arith.constant 0 : i32
    %c0_i32_1 = arith.constant 0 : i32
    return %arg0, %c0_i32, %arg1, %c0_i32_0 : i32, i32, i32, i32
  }
  func.func @transform_2(%arg0: i32, %arg1: i32) -> (i32, i32, i32, i32) {
    %c0_i32 = arith.constant 0 : i32
    %c0_i32_0 = arith.constant 0 : i32
    %c0_i32_1 = arith.constant 0 : i32
    return %arg0, %c0_i32, %arg1, %c0_i32_0 : i32, i32, i32, i32
  }
  func.func @transform_3(%arg0: i32, %arg1: i32) -> (i32, i32, i32, i32) {
    %c0_i32 = arith.constant 0 : i32
    %c0_i32_0 = arith.constant 0 : i32
    %c0_i32_1 = arith.constant 0 : i32
    return %arg0, %c0_i32, %arg1, %c0_i32_0 : i32, i32, i32, i32
  }
  func.func @transform_4(%arg0: i32, %arg1: i32) -> (i32, i32, i32, i32) {
    %c0_i32 = arith.constant 0 : i32
    %c0_i32_0 = arith.constant 0 : i32
    %c0_i32_1 = arith.constant 0 : i32
    return %arg0, %c0_i32, %arg1, %c0_i32_0 : i32, i32, i32, i32
  }
  func.func @transform_5(%arg0: i32, %arg1: i32) -> (i32, i32, i32, i32) {
    %c0_i32 = arith.constant 0 : i32
    %c0_i32_0 = arith.constant 0 : i32
    %c0_i32_1 = arith.constant 0 : i32
    return %arg0, %c0_i32, %arg1, %c0_i32_0 : i32, i32, i32, i32
  }
}

</mosaic_0001>

<bundles_post_ra>
// kernel: custom-call.3
= control target key start
LH: loop header
LB: loop body
LE: loop exit
PB: predicated region body
PF: predicated region fallthrough
CT: control target
= control target key end

     0   :  { %s92_s0 = inlined_call_operand.vmem [shape: f32[2,4,32,32], index: 0, kind: input, shape index: {}]   ;;  %s93_s1 = inlined_call_operand.vmem [shape: f32[2,4,32,32], index: 1, kind: input, shape index: {}]   ;;  %s94_s2 = inlined_call_operand.hbm [shape: c64[2,4,32,32], index: 2, kind: output, shape index: {}]  }
   0x1   :  { %s3_s11 = scalar_lea.hbm %s94_s2, 4096 }
   0x2   :  { %4 = vsyncpa [#allocation0], 0  ;;  %s5_s14 = sshll.u32 %s92_s0, 4  ;;  %s6_s14 = int_to_ptr.vmem [resolvable:$true] %s5_s14 }
   0x3   :  { %s18_s15 = scalar_lea.vmem %s6_s14, 4096  ;;  %p23_p1 = scmp.lt.s32.totalorder %s6_s14, %s6_s14 }
   0x4   :  { %p19_p0 = scmp.ne.s32.totalorder %s6_s14, %s18_s15  ;;  %p24_p2 = scmp.lt.s32.totalorder %s18_s15, %s18_s15 }
   0x6   :  { %p25_p3 = por %p24_p2, %p23_p1 }
   0x8   :  { %p26_p4 = pnand %p25_p3, %p19_p0 }
   0xa   :  { %29 = shalt.err (!%p26_p4)  }
   0xb   :  { %8 = dma.vmem_to_hbm [thread:$0]  %s6_s14, 4096, %s94_s2, [#allocation0] }
   0xc   :  { %61 = dma.done.wait [#allocation0], 4096  }
   0xd   :  { %62 = vsyncadd [#allocation0], 4294963200 }
   0xe   :  { %10 = vsyncpa [#allocation0], 1 }
   0xf   :  { %11 = vsyncpa [#allocation1], 0  ;;  %s12_s0 = sshll.u32 %s93_s1, 4  ;;  %s13_s0 = int_to_ptr.vmem [resolvable:$true] %s12_s0 }
  0x10   :  { %s38_s20 = scalar_lea.vmem %s13_s0, 4096  ;;  %p43_p6 = scmp.lt.s32.totalorder %s13_s0, %s13_s0 }
  0x11   :  { %p39_p5 = scmp.ne.s32.totalorder %s13_s0, %s38_s20  ;;  %p44_p7 = scmp.lt.s32.totalorder %s38_s20, %s38_s20 }
  0x13   :  { %p45_p8 = por %p44_p7, %p43_p6 }
  0x15   :  { %p46_p9 = pnand %p45_p8, %p39_p5 }
  0x17   :  { %49 = shalt.err (!%p46_p9)  }
  0x18   :  { %15 = dma.vmem_to_hbm [thread:$0]  %s13_s0, 4096, %s3_s11, [#allocation1] }
  0x19   :  { %63 = dma.done.wait [#allocation1], 4096  }
  0x1a   :  { %64 = vsyncadd [#allocation1], 4294963200 }
  0x1b   :  { %17 = vsyncpa [#allocation1], 1 }

// kernel: custom-call
= control target key start
LH: loop header
LB: loop body
LE: loop exit
PB: predicated region body
PF: predicated region fallthrough
CT: control target
= control target key end

     0   :  { %2 = vsyncpa [#allocation0], 0  ;;  %s47_s0 = inlined_call_operand.hbm [shape: c64[2,4,32,32], index: 0, kind: input, shape index: {}]   ;;  %s48_s1 = inlined_call_operand.vmem [shape: f32[2,4,32,32], index: 1, kind: output, shape index: {}]  }
   0x1   :  { %s3_s8 = sshll.u32 %s48_s1, 4  ;;  %s4_s8 = int_to_ptr.vmem [resolvable:$true] %s3_s8 }
   0x2   :  { %s17_s9 = scalar_lea.vmem %s4_s8, 4096  ;;  %p22_p1 = scmp.lt.s32.totalorder %s4_s8, %s4_s8 }
   0x3   :  { %p18_p0 = scmp.ne.s32.totalorder %s4_s8, %s17_s9  ;;  %p23_p2 = scmp.lt.s32.totalorder %s17_s9, %s17_s9 }
   0x5   :  { %p24_p3 = por %p23_p2, %p22_p1 }
   0x7   :  { %p25_p4 = pnand %p24_p3, %p18_p0 }
   0x9   :  { %28 = shalt.err (!%p25_p4)  }
   0xa   :  { %6 = dma.hbm_to_vmem [thread:$0]  %s47_s0, 4096, %s4_s8, [#allocation0] }
   0xb   :  { %29 = dma.done.wait [#allocation0], 4096  }
   0xc   :  { %30 = vsyncadd [#allocation0], 4294963200 }
   0xd   :  { %8 = vsyncpa [#allocation0], 1 }

// kernel: custom-call.1
= control target key start
LH: loop header
LB: loop body
LE: loop exit
PB: predicated region body
PF: predicated region fallthrough
CT: control target
= control target key end

     0   :  { %s51_s0 = inlined_call_operand.hbm [shape: c64[2,4,32,32], index: 0, kind: input, shape index: {}]   ;;  %s52_s1 = inlined_call_operand.vmem [shape: f32[2,4,32,32], index: 1, kind: output, shape index: {}]  }
   0x1   :  { %s2_s8 = scalar_lea.hbm %s51_s0, 4096 }
   0x2   :  { %3 = vsyncpa [#allocation0], 0  ;;  %s4_s11 = sshll.u32 %s52_s1, 4  ;;  %s5_s11 = int_to_ptr.vmem [resolvable:$true] %s4_s11 }
   0x3   :  { %s20_s12 = scalar_lea.vmem %s5_s11, 4096  ;;  %p25_p1 = scmp.lt.s32.totalorder %s5_s11, %s5_s11 }
   0x4   :  { %p21_p0 = scmp.ne.s32.totalorder %s5_s11, %s20_s12  ;;  %p26_p2 = scmp.lt.s32.totalorder %s20_s12, %s20_s12 }
   0x6   :  { %p27_p3 = por %p26_p2, %p25_p1 }
   0x8   :  { %p28_p4 = pnand %p27_p3, %p21_p0 }
   0xa   :  { %31 = shalt.err (!%p28_p4)  }
   0xb   :  { %7 = dma.hbm_to_vmem [thread:$0]  %s2_s8, 4096, %s5_s11, [#allocation0] }
   0xc   :  { %33 = dma.done.wait [#allocation0], 4096  }
   0xd   :  { %34 = vsyncadd [#allocation0], 4294963200 }
   0xe   :  { %9 = vsyncpa [#allocation0], 1 }

// kernel: custom-call.2
= control target key start
LH: loop header
LB: loop body
LE: loop exit
PB: predicated region body
PF: predicated region fallthrough
CT: control target
= control target key end

     0   :  { %s92_s0 = inlined_call_operand.vmem [shape: f32[2,1,32,32], index: 0, kind: input, shape index: {}]   ;;  %s93_s1 = inlined_call_operand.vmem [shape: f32[2,1,32,32], index: 1, kind: input, shape index: {}]   ;;  %s94_s2 = inlined_call_operand.hbm [shape: c64[2,1,32,32], index: 2, kind: output, shape index: {}]  }
   0x1   :  { %s3_s11 = scalar_lea.hbm %s94_s2, 1024 }
   0x2   :  { %4 = vsyncpa [#allocation0], 0  ;;  %s5_s14 = sshll.u32 %s92_s0, 4  ;;  %s6_s14 = int_to_ptr.vmem [resolvable:$true] %s5_s14 }
   0x3   :  { %s18_s15 = scalar_lea.vmem %s6_s14, 1024  ;;  %p23_p1 = scmp.lt.s32.totalorder %s6_s14, %s6_s14 }
   0x4   :  { %p19_p0 = scmp.ne.s32.totalorder %s6_s14, %s18_s15  ;;  %p24_p2 = scmp.lt.s32.totalorder %s18_s15, %s18_s15 }
   0x6   :  { %p25_p3 = por %p24_p2, %p23_p1 }
   0x8   :  { %p26_p4 = pnand %p25_p3, %p19_p0 }
   0xa   :  { %29 = shalt.err (!%p26_p4)  }
   0xb   :  { %8 = dma.vmem_to_hbm [thread:$0]  %s6_s14, 1024, %s94_s2, [#allocation0] }
   0xc   :  { %61 = dma.done.wait [#allocation0], 1024  }
   0xd   :  { %62 = vsyncadd [#allocation0], 4294966272 }
   0xe   :  { %10 = vsyncpa [#allocation0], 1 }
   0xf   :  { %11 = vsyncpa [#allocation1], 0  ;;  %s12_s0 = sshll.u32 %s93_s1, 4  ;;  %s13_s0 = int_to_ptr.vmem [resolvable:$true] %s12_s0 }
  0x10   :  { %s38_s20 = scalar_lea.vmem %s13_s0, 1024  ;;  %p43_p6 = scmp.lt.s32.totalorder %s13_s0, %s13_s0 }
  0x11   :  { %p39_p5 = scmp.ne.s32.totalorder %s13_s0, %s38_s20  ;;  %p44_p7 = scmp.lt.s32.totalorder %s38_s20, %s38_s20 }
  0x13   :  { %p45_p8 = por %p44_p7, %p43_p6 }
  0x15   :  { %p46_p9 = pnand %p45_p8, %p39_p5 }
  0x17   :  { %49 = shalt.err (!%p46_p9)  }
  0x18   :  { %15 = dma.vmem_to_hbm [thread:$0]  %s13_s0, 1024, %s3_s11, [#allocation1] }
  0x19   :  { %63 = dma.done.wait [#allocation1], 1024  }
  0x1a   :  { %64 = vsyncadd [#allocation1], 4294966272 }
  0x1b   :  { %17 = vsyncpa [#allocation1], 1 }

// kernel: multi_channel_deconv.1
= control target key start
LH: loop header
LB: loop body
LE: loop exit
PB: predicated region body
PF: predicated region fallthrough
CT: control target
= control target key end

     0   :  { %s762_s18 = smov 0   ;;  %s764_s19 = smov 0   ;;  %s844_s0 = inlined_call_operand.vmem [shape: f32[2,4,8,128], index: 0, kind: input, shape index: {}]   ;;  %s845_s1 = inlined_call_operand.vmem [shape: f32[2,4,8,128], index: 1, kind: input, shape index: {}]   ;;  %s846_s2 = inlined_call_operand.vmem [shape: f32[2,4,8,128], index: 2, kind: input, shape index: {}]   ;;  %s847_s3 = inlined_call_operand.vmem [shape: f32[2,4,8,128], index: 3, kind: input, shape index: {}]   ;;  %s848_s4 = inlined_call_operand.vmem [shape: f32[2,1,8,128], index: 4, kind: output, shape index: {0}]   ;;  %s849_s5 = inlined_call_operand.vmem [shape: f32[2,1,8,128], index: 5, kind: output, shape index: {1}]  }
   0x1   :  { %s766_s20 = smov 0  }
   0x2 LB: > { %s28_s21 = sadd.s32 1, %s710_s19  ;;  %p600_p0 = scmp.ge.s32.totalorder %s714_s20, 1  ;;  %s714_s20 = sphi %s766_s20, %s16_s20   ;;  %s710_s19 = sphi %s764_s19, %s851_s19   ;;  %s706_s18 = sphi %s762_s18, %s850_s18  }
   0x3   : > { %p30_p1 = scmp.ge.s32.totalorder %s28_s21, 2  ;;  %p256_p2 = scmp.lt.s32.totalorder %s714_s20, 3 }
   0x5   : > { %s853_s21 = smov (%p30_p1, %s28_s21), 0  ;;  %p257_p3 = pnand %p600_p0, %p256_p2 }
   0x6   : > { %p320_p4 = scmp.lt.s32.totalorder (!%p257_p3), %s706_s18, 1  ;;  %s808_s17 = smov (!%p257_p3), 0  }
   0x7   : > { %260 = sbr.rel (%p257_p3) target bundleno = 44 (0x2c), region = 36 }
   0xc   : > { %s855_s18 = smov (!%p320_p4, %s706_s18), 1  ;;  %v716_v0 = vmov 0.0   ;;  %v720_v1 = vmov 0.0   ;;  %v724_v2 = vmov 0.0  }
   0xd   : > { %s780_s22 = sshll.u32 %s855_s18, 5  ;;  %s609_s23 = sshll.u32 %s855_s18, 3 }
   0xe   : > { %s327_s26 = scalar_lea.vmem %s844_s0, %s780_s22  ;;  %s335_s29 = scalar_lea.vmem %s845_s1, %s780_s22 }
   0xf   : > { %s343_s7 = scalar_lea.vmem %s846_s2, %s780_s22  ;;  %s351_s10 = scalar_lea.vmem %s847_s3, %s780_s22 }
  0x10   : > { %s801_s13 = scalar_lea.vmem %s848_s4, %s609_s23  ;;  %s806_s16 = scalar_lea.vmem %s849_s5, %s609_s23 }
  0x11 LB: >> { %s611_s18 = sshll.u32 %s730_s17, 3  ;;  %s371_s17 = sadd.s32 1, %s730_s17   ;;  %s730_s17 = sphi %s808_s17, %s371_s17   ;;  %v726_v2 = vphi %v724_v2, %v725_v2   ;;  %v722_v1 = vphi %v720_v1, %v721_v1   ;;  %v718_v0 = vphi %v716_v0, %v717_v0  }
  0x12   : >> { %s377_s25 = scalar_lea.vmem %s327_s26, %s611_s18  ;;  %s379_s30 = scalar_lea.vmem %s335_s29, %s611_s18 }
  0x13   : >> { %v378_v3 = vld [vmem:[%s377_s25] sm:$0xff]  ;;  %s381_s9 = scalar_lea.vmem %s343_s7, %s611_s18  ;;  %s383_s14 = scalar_lea.vmem %s351_s10, %s611_s18 }
  0x14   : >> { %v380_v4 = vld [vmem:[%s379_s30] sm:$0xff]  ;;  %v393_v7 = vmul.f32 %v378_v3, %v378_v3  ;;  %p368_p5 = scmp.ge.s32.totalorder %s371_s17, 4  }
  0x15   : >> { %v382_v5 = vld [vmem:[%s381_s9] sm:$0xff]  ;;  %v394_v8 = vmul.f32 %v380_v4, %v380_v4 }
  0x16   : >> { %v384_v6 = vld [vmem:[%s383_s14] sm:$0xff]  ;;  %v385_v9 = vmul.f32 %v382_v5, %v378_v3  ;;  %v390_v12 = vmul.f32 %v382_v5, %v380_v4 }
  0x17   : >> { %v386_v10 = vmul.f32 %v384_v6, %v380_v4  ;;  %v389_v11 = vmul.f32 %v384_v6, %v378_v3  ;;  %v395_v13 = vadd.f32 %v394_v8, %v393_v7 }
  0x19   : >> { %v387_v14 = vadd.f32 %v386_v10, %v385_v9  ;;  %v391_v15 = vsub.f32 %v389_v11, %v390_v12  ;;  %v396_v16 = vadd.f32 %v718_v0, %v395_v13   ;;  %370 = sbr.rel (!%p368_p5) target bundleno = 17 (0x11), region = 98 }
  0x1b   : >> { %v388_v17 = vadd.f32 %v726_v2, %v387_v14   ;;  %v392_v18 = vadd.f32 %v722_v1, %v391_v15   ;;  %v717_v0 = vmov %v396_v16   ;;  %674 = vrcp.f32 (%p368_p5), %v396_v16 }
  0x1d   : >> { %v721_v1 = vmov %v392_v18   ;;  %v725_v2 = vmov %v388_v17  }
  0x28   : > { %v675_v19 = vpop.eup %674 }
  0x29   : > { %v398_v20 = vmul.f32 %v675_v19, %v388_v17  ;;  %v400_v21 = vmul.f32 %v675_v19, %v392_v18 }
  0x2b   : > { %399 = vst [vmem:[%s801_s13] sm:$0xff] %v398_v20  ;;  %401 = vst [vmem:[%s806_s16] sm:$0xff] %v400_v21 }
  0x2c PF: > { %s16_s20 = sadd.s32 1, %s714_s20   ;;  %s850_s18 = smov %s710_s19 }
  0x2d   : > { %p13_p6 = scmp.ge.s32.totalorder %s16_s20, 4   ;;  %s851_s19 = smov %s853_s21 }
  0x2f   :  { %15 = sbr.rel (!%p13_p6) target bundleno = 2 (0x2), region = 109 }

</bundles_post_ra>
